<compile_context>
chip_gen: v6e
topology: v6e:2x2x1
jax: 0.10.0
libtpu: 0.0.40
codegen_flags: <defaults>
</compile_context>

<pallas_src>
import functools

import jax
import jax.numpy as jnp
from jax import lax
from jax.experimental import pallas as pl
from jax.experimental.pallas import tpu as pltpu

EPS = 1e-6  # torch.nn.functional.pairwise_distance default eps (added to the difference)


def _contrastive_loss_kernel(x1_ref, x2_ref, label_ref, out_ref, *,
                             margin, tile_rows, n_valid):
    i = pl.program_id(0)

    # Upcast inside the kernel (inputs may be bf16); all math in f32.
    x1 = x1_ref[...].astype(jnp.float32)                        # (tile_rows, D)
    x2 = x2_ref[...].astype(jnp.float32)
    diff = x1 - x2 + EPS
    sq_dist = jnp.sum(diff * diff, axis=-1, keepdims=True)      # (tile_rows, 1)
    dist = jnp.sqrt(sq_dist)                                    # sqrt only feeds the hinge term

    lbl = label_ref[...]                                        # (tile_rows, 1) f32, per-tile DMA

    loss_positive = lbl * sq_dist                               # d^2 == sq_dist (skip resquare)
    hinge = jnp.maximum(margin - dist, 0.0)
    loss_negative = (1.0 - lbl) * (hinge * hinge)

    # Mask padded rows of the last tile out of the sum (mean divides by the true B in wrapper).
    rows = i * tile_rows + lax.broadcasted_iota(jnp.int32, (tile_rows, 1), 0)
    valid = rows < n_valid
    tile_sum = jnp.sum(jnp.where(valid, loss_positive + loss_negative, 0.0))

    # One partial sum per tile, written as a full lane-dense (1, 8, 128) block (unmasked store);
    # the wrapper reads element [i, 0, 0] of each block and reduces.
    out_ref[...] = jnp.broadcast_to(tile_sum.astype(jnp.float32), (1, 8, 128))


def contrastive_loss(output1, output2, label, margin=1.0, *, max_rows_per_tile=None):
    """output1, output2: (B, D) float arrays; label: (B,) or (B, 1). Returns scalar f32."""
    B, D = output1.shape
    itemsize = jnp.dtype(output1.dtype).itemsize

    # Sublane packing granularity: f32 -> 8 rows, bf16 -> 16, int8/fp8 -> 32.
    row_mult = max(8, 32 // itemsize)

    # Laid-out (VMEM) bytes per batch row across all per-tile operands:
    #   x1 + x2 rows are lane-padded to a multiple of 128; the (tile_rows, 1) f32 label column
    #   is lane-padded to 128 lanes (512 B/row).
    lanes = -(-D // 128) * 128
    row_bytes = 2 * lanes * itemsize + 128 * 4

    # ~4 MiB of laid-out VMEM per buffered copy of the tiled operands. Pallas double-buffers
    # (=> ~8 MiB), and the f32 elementwise intermediates need headroom under the 32 MiB
    # scoped-VMEM limit set below (safe on v5e/v6e/v7x).
    max_copy_bytes = 4 * 1024 * 1024
    rows_by_vmem = max(row_mult, (max_copy_bytes // row_bytes) // row_mult * row_mult)
    rows_needed = -(-B // row_mult) * row_mult
    tile_rows = int(min(rows_by_vmem, rows_needed))
    if max_rows_per_tile is not None:  # test hook to force the multi-tile path at small B
        tile_rows = int(min(tile_rows,
                            max(row_mult, max_rows_per_tile // row_mult * row_mult)))

    num_tiles = -(-B // tile_rows)
    b_pad = num_tiles * tile_rows

    x1 = output1
    x2 = output2
    lbl = jnp.reshape(label, (B, 1)).astype(jnp.float32)
    if b_pad != B:
        pad = ((0, b_pad - B), (0, 0))
        x1 = jnp.pad(x1, pad)
        x2 = jnp.pad(x2, pad)
        lbl = jnp.pad(lbl, pad)

    kernel = functools.partial(
        _contrastive_loss_kernel,
        margin=float(margin),
        tile_rows=tile_rows,
        n_valid=B,
    )

    partials = pl.pallas_call(
        kernel,
        out_shape=jax.ShapeDtypeStruct((num_tiles, 8, 128), jnp.float32),
        grid=(num_tiles,),
        in_specs=[
            pl.BlockSpec((tile_rows, D), lambda i: (i, 0)),
            pl.BlockSpec((tile_rows, D), lambda i: (i, 0)),
            pl.BlockSpec((tile_rows, 1), lambda i: (i, 0)),
        ],
        out_specs=pl.BlockSpec((1, 8, 128), lambda i: (i, 0, 0)),
        compiler_params=pltpu.CompilerParams(
            # Fully data-parallel grid: disjoint input/output blocks per step, so megacore can
            # shard the batch axis across both TensorCores on v7x.
            dimension_semantics=("parallel",),
            vmem_limit_bytes=32 * 1024 * 1024,
        ),
    )(x1, x2, lbl)

    # mean(loss_p + loss_n) / 2, dividing by the true (unpadded) batch size.
    return jnp.sum(partials[:, 0, 0]) * (1.0 / (2.0 * B))


def _reference(output1, output2, label, margin=1.0):
    # Pure-JAX reference mirroring the PyTorch module.
    o1 = output1.astype(jnp.float32)
    o2 = output2.astype(jnp.float32)
    d = jnp.sqrt(jnp.sum((o1 - o2 + EPS) ** 2, axis=-1))
    lbl = jnp.reshape(label, d.shape).astype(jnp.float32)
    loss = lbl * d**2 + (1.0 - lbl) * jnp.maximum(margin - d, 0.0) ** 2
    return jnp.mean(loss) / 2.0


if __name__ == "__main__":
    key = jax.random.PRNGKey(0)
    k1, k2, k3, k4, k5, k6, k7, k8, k9 = jax.random.split(key, 9)

    # Case 1: f32 inputs, batch not a multiple of 8 -> exercises padding + in-kernel masking.
    B, D = 10, 32
    o1 = jax.random.normal(k1, (B, D), dtype=jnp.float32)
    o2 = jax.random.normal(k2, (B, D), dtype=jnp.float32)
    lab = jax.random.bernoulli(k3, 0.5, (B,)).astype(jnp.float32)
    loss = jax.block_until_ready(contrastive_loss(o1, o2, lab, margin=1.0))
    ref = _reference(o1, o2, lab, margin=1.0)
    assert jnp.allclose(loss, ref, rtol=1e-5, atol=1e-5), (loss, ref)

    # Case 2: bf16 inputs stay bf16 across the HBM->VMEM DMA; upcast happens inside the kernel.
    B2, D2 = 12, 32
    p1 = jax.random.normal(k4, (B2, D2), dtype=jnp.float32).astype(jnp.bfloat16)
    p2 = jax.random.normal(k5, (B2, D2), dtype=jnp.float32).astype(jnp.bfloat16)
    lab2 = jax.random.bernoulli(k6, 0.5, (B2,)).astype(jnp.float32)
    loss2 = jax.block_until_ready(contrastive_loss(p1, p2, lab2, margin=1.0))
    ref2 = _reference(p1, p2, lab2, margin=1.0)
    assert jnp.allclose(loss2, ref2, rtol=1e-4, atol=1e-4), (loss2, ref2)

    # Case 3: force several tiles (parallel grid, per-tile partial sums, padded last tile).
    B3, D3 = 44, 48
    q1 = jax.random.normal(k7, (B3, D3), dtype=jnp.float32)
    q2 = jax.random.normal(k8, (B3, D3), dtype=jnp.float32)
    lab3 = jax.random.bernoulli(k9, 0.5, (B3,)).astype(jnp.float32)
    loss3 = jax.block_until_ready(
        contrastive_loss(q1, q2, lab3, margin=1.0, max_rows_per_tile=16))
    ref3 = _reference(q1, q2, lab3, margin=1.0)
    assert jnp.allclose(loss3, ref3, rtol=1e-5, atol=1e-5), (loss3, ref3)

    print("KERNEL_OK")
</pallas_src>

<mosaic_0001>
module attributes {stable_mosaic.version = 11 : i64} {
  func.func @_contrastive_loss_kernel(%arg0: i32, %arg1: memref<16x32xf32, #tpu.memory_space<vmem>>, %arg2: memref<16x32xf32, #tpu.memory_space<vmem>>, %arg3: memref<16x1xf32, #tpu.memory_space<vmem>>, %arg4: memref<1x8x128xf32, #tpu.memory_space<vmem>>) attributes {dimension_semantics = [#tpu.dimension_semantics<parallel>], iteration_bounds = array<i64: 1>, scalar_prefetch = 0 : i64, scratch_operands = 0 : i64, tpu.core_type = #tpu.core_type<tc>, window_params = [{transform_indices = @transform_0, window_bounds = array<i64: 16, 32>}, {transform_indices = @transform_1, window_bounds = array<i64: 16, 32>}, {transform_indices = @transform_2, window_bounds = array<i64: 16, 1>}, {transform_indices = @transform_3, window_bounds = array<i64: 1, 8, 128>}]} {
    %c0 = arith.constant 0 : index
    %c0_0 = arith.constant 0 : index
    %0 = vector.load %arg1[%c0, %c0_0] : memref<16x32xf32, #tpu.memory_space<vmem>>, vector<16x32xf32>
    %c0_1 = arith.constant 0 : index
    %c0_2 = arith.constant 0 : index
    %1 = vector.load %arg2[%c0_1, %c0_2] : memref<16x32xf32, #tpu.memory_space<vmem>>, vector<16x32xf32>
    %2 = arith.subf %0, %1 : vector<16x32xf32>
    %cst = arith.constant 9.99999997E-7 : f32
    %3 = vector.broadcast %cst : f32 to vector<16x32xf32>
    %4 = arith.addf %2, %3 : vector<16x32xf32>
    %5 = arith.mulf %4, %4 : vector<16x32xf32>
    %cst_3 = arith.constant dense<0.000000e+00> : vector<16xf32>
    %6 = vector.multi_reduction <add>, %5, %cst_3 [1] : vector<16x32xf32> to vector<16xf32>
    %7 = vector.shape_cast %6 : vector<16xf32> to vector<16x1xf32>
    %8 = math.sqrt %7 : vector<16x1xf32>
    %c0_4 = arith.constant 0 : index
    %c0_5 = arith.constant 0 : index
    %9 = vector.load %arg3[%c0_4, %c0_5] : memref<16x1xf32, #tpu.memory_space<vmem>>, vector<16x1xf32>
    %10 = arith.mulf %9, %7 : vector<16x1xf32>
    %cst_6 = arith.constant 1.000000e+00 : f32
    %11 = vector.broadcast %cst_6 : f32 to vector<16x1xf32>
    %12 = arith.subf %11, %8 : vector<16x1xf32>
    %cst_7 = arith.constant 0.000000e+00 : f32
    %13 = vector.broadcast %cst_7 : f32 to vector<16x1xf32>
    %14 = arith.maximumf %12, %13 : vector<16x1xf32>
    %cst_8 = arith.constant 1.000000e+00 : f32
    %15 = vector.broadcast %cst_8 : f32 to vector<16x1xf32>
    %16 = arith.subf %15, %9 : vector<16x1xf32>
    %17 = arith.mulf %14, %14 : vector<16x1xf32>
    %18 = arith.mulf %16, %17 : vector<16x1xf32>
    %c16_i32 = arith.constant 16 : i32
    %19 = arith.muli %arg0, %c16_i32 : i32
    %20 = tpu.iota {dimensions = array<i32: 0>} : vector<16x1xi32>
    %21 = vector.broadcast %19 : i32 to vector<16x1xi32>
    %22 = arith.addi %21, %20 : vector<16x1xi32>
    %c10_i32 = arith.constant 10 : i32
    %23 = vector.broadcast %c10_i32 : i32 to vector<16x1xi32>
    %24 = arith.cmpi slt, %22, %23 : vector<16x1xi32>
    %25 = arith.addf %10, %18 : vector<16x1xf32>
    %cst_9 = arith.constant 0.000000e+00 : f32
    %26 = vector.broadcast %cst_9 : f32 to vector<16x1xf32>
    %27 = arith.select %24, %25, %26 : vector<16x1xi1>, vector<16x1xf32>
    %28 = vector.shape_cast %27 : vector<16x1xf32> to vector<1x16x1xf32>
    %cst_10 = arith.constant dense<0.000000e+00> : vector<1xf32>
    %29 = vector.multi_reduction <add>, %28, %cst_10 [1, 2] : vector<1x16x1xf32> to vector<1xf32>
    %30 = vector.shape_cast %29 : vector<1xf32> to vector<1x1x1xf32>
    %31 = vector.extract %30[0, 0, 0] : f32 from vector<1x1x1xf32>
    %32 = vector.broadcast %31 : f32 to vector<1x8x128xf32>
    %c0_11 = arith.constant 0 : index
    %c0_12 = arith.constant 0 : index
    %c0_13 = arith.constant 0 : index
    %33 = vector.load %arg4[%c0_11, %c0_12, %c0_13] : memref<1x8x128xf32, #tpu.memory_space<vmem>>, vector<1x8x128xf32>
    tpu.vector_store %arg4[%c0_11, %c0_12, %c0_13], %32 {strides = array<i32>} : memref<1x8x128xf32, #tpu.memory_space<vmem>>, vector<1x8x128xf32>,
    return
  }
  func.func @transform_0(%arg0: i32) -> (i32, i32) {
    %c0_i32 = arith.constant 0 : i32
    %c0_i32_0 = arith.constant 0 : i32
    return %arg0, %c0_i32 : i32, i32
  }
  func.func @transform_1(%arg0: i32) -> (i32, i32) {
    %c0_i32 = arith.constant 0 : i32
    %c0_i32_0 = arith.constant 0 : i32
    return %arg0, %c0_i32 : i32, i32
  }
  func.func @transform_2(%arg0: i32) -> (i32, i32) {
    %c0_i32 = arith.constant 0 : i32
    %c0_i32_0 = arith.constant 0 : i32
    return %arg0, %c0_i32 : i32, i32
  }
  func.func @transform_3(%arg0: i32) -> (i32, i32, i32) {
    %c0_i32 = arith.constant 0 : i32
    %c0_i32_0 = arith.constant 0 : i32
    %c0_i32_1 = arith.constant 0 : i32
    return %arg0, %c0_i32, %c0_i32_0 : i32, i32, i32
  }
}

</mosaic_0001>

<bundles_post_ra>
// kernel: tpu_custom_call.1
= control target key start
LH: loop header
LB: loop body
LE: loop exit
PB: predicated region body
PF: predicated region fallthrough
CT: control target
= control target key end

     0   :  { %8 = vsyncpa [#allocation3], 0  ;;  %s213_s0 = inlined_call_operand.vmem [shape: f32[16,32], index: 0, kind: input, shape index: {}]   ;;  %s214_s1 = inlined_call_operand.hbm [shape: f32[16,32], index: 1, kind: input, shape index: {}]   ;;  %s215_s2 = inlined_call_operand.vmem [shape: f32[16,1], index: 2, kind: input, shape index: {}]   ;;  %s216_s3 = inlined_call_operand.hbm [shape: f32[1,8,128], index: 3, kind: output, shape index: {}]  }
   0x1   :  { %9 = vsyncpa [#allocation4], 0  ;;  %s171_s12 = smov [#allocation2]  }
   0x2   :  { %s17_s13 = sshll.u32 %s171_s12, 4  ;;  %s18_s13 = int_to_ptr.vmem [resolvable:$true] %s17_s13 }
   0x3   :  { %s135_s14 = scalar_lea.vmem %s18_s13, 256  ;;  %p140_p1 = scmp.lt.s32.totalorder %s18_s13, %s18_s13 }
   0x4   :  { %p136_p0 = scmp.ne.s32.totalorder %s18_s13, %s135_s14  ;;  %p141_p2 = scmp.lt.s32.totalorder %s135_s14, %s135_s14 }
   0x6   :  { %p142_p3 = por %p141_p2, %p140_p1 }
   0x8   :  { %p143_p4 = pnand %p142_p3, %p136_p0 }
   0xa   :  { %146 = shalt.err (!%p143_p4)
}
   0xb   :  { %s172_s15 = smov 128   ;;  %s173_s16 = smov 8  }
   0xc   :  { %23 = dma.hbm_to_vmem [thread:$0]  %s214_s1, 256, %s18_s13, [#allocation3], %s172_s15, %s172_s15, %s173_s16  }
   0xd   :  { %167 = dma.done.wait [#allocation3], 256  }
   0xe   :  { %168 = vsyncadd [#allocation3], 4294967040  ;;  %v30_v0 = vld [vmem:[%s213_s0 + $0x8] sm:$0xff]  ;;  %v29_v2 = vld [vmem:[%s213_s0] sm:$0xff]  ;;  %vm39_vm0 = vcmask 261120   ;;  %v75_v16 = vlaneseq  ;;  %vm87_vm6 = vcmask 7168  }
   0xf   :  { %v32_v1 = vld [vmem:[#allocation2 + $0x8] sm:$0xff]  ;;  %v31_v4 = vld [vmem:[#allocation2] sm:$0xff] }
  0x10   :  { %v34_v3 = vsub.f32 %v30_v0, %v32_v1  ;;  %v33_v5 = vsub.f32 %v29_v2, %v31_v4  ;;  %v76_v23 = vshrl.u32 %v75_v16, 7  ;;  %v61_v25 = vld [vmem:[%s215_s2 + $0x8] sm:$0xff]  ;;  %v60_v33 = vld [vmem:[%s215_s2] sm:$0xff]  ;;  %s174_s2 = smov [#allocation5]  }
  0x11   :  { %v69_v28 = vsub.f32 1.0, %v61_v25  ;;  %v68_v36 = vsub.f32 1.0, %v60_v33  ;;  %s108_s25 = sshll.u32 %s174_s2, 4  ;;  %s109_s25 = int_to_ptr.vmem [resolvable:$true] %s108_s25 }
  0x12   :  { %v36_v6 = vadd.f32 1e-06, %v34_v3  ;;  %v35_v7 = vadd.f32 1e-06, %v33_v5  ;;  %v77_v32 = vadd.s32 8, %v76_v23  ;;  %s147_s27 = scalar_lea.vmem %s109_s25, 128  ;;  %p152_p6 = scmp.lt.s32.totalorder %s109_s25, %s109_s25 }
  0x13   :  { %p148_p5 = scmp.ne.s32.totalorder %s109_s25, %s147_s27  ;;  %p153_p7 = scmp.lt.s32.totalorder %s147_s27, %s147_s27 }
  0x14   :  { %v38_v8 = vmul.f32 %v36_v6, %v36_v6  ;;  %v37_v9 = vmul.f32 %v35_v7, %v35_v7  ;;  %vm82_vm5 = vcmp.lt.s32.totalorder %v77_v32, 10 }
  0x15   :  { %p154_p8 = por %p153_p7, %p152_p6 }
  0x16   :  { %v43_v10 = vsel %vm39_vm0, %v38_v8, 0.0  ;;  %v40_v11 = vsel %vm39_vm0, %v37_v9, 0.0 }
  0x17   :  { %44 = vadd.xlane.f32.xlu0 %v43_v10  ;;  %p155_p9 = pnand %p154_p8, %p148_p5 }
  0x1b   :  { %41 = vadd.xlane.f32.xlu0 %v40_v11 }
  0xa0   :  { %v45_v12 = vpop.xlane.xlu0 %44 }
  0xa1   :  { %123 = vrsqrt.f32 %v45_v12  ;;  %vm55_vm1 = vcmp.eq.f32.partialorder %v45_v12, inf  ;;  %v58_v17 = vand.u32 2147483648, %v45_v12  ;;  %vm57_vm2 = vcmp.eq.f32.partialorder %v45_v12, 0.0 }
  0xa2   :  { %v63_v34 = vmul.f32 %v61_v25, %v45_v12 }
  0xa4   :  { %v42_v13 = vpop.xlane.xlu0 %41 }
  0xa5   :  { %125 = vrsqrt.f32 %v42_v13  ;;  %vm48_vm3 = vcmp.eq.f32.partialorder %v42_v13, inf  ;;  %v51_v24 = vand.u32 2147483648, %v42_v13  ;;  %vm50_vm4 = vcmp.eq.f32.partialorder %v42_v13, 0.0 }
  0xa6   :  { %v62_v40 = vmul.f32 %v60_v33, %v42_v13 }
  0xae   :  { %v124_v14 = vpop.eup %123 }
  0xaf   :  { %v54_v15 = vmul.f32 %v124_v14, %v45_v12 }
  0xb1   :  { %v56_v18 = vsel %vm55_vm1, %v45_v12, %v54_v15 }
  0xb2   :  { %v126_v19 = vpop.eup %125  ;;  %v59_v20 = vsel %vm57_vm2, %v58_v17, %v56_v18 }
  0xb3   :  { %v47_v21 = vmul.f32 %v126_v19, %v42_v13  ;;  %v65_v22 = vsub.f32 1.0, %v59_v20 }
  0xb5   :  { %v49_v26 = vsel %vm48_vm3, %v42_v13, %v47_v21  ;;  %v67_v27 = vmax.f32 %v65_v22, 0.0 }
  0xb6   :  { %v52_v29 = vsel %vm50_vm4, %v51_v24, %v49_v26 }
  0xb7   :  { %v64_v30 = vsub.f32 1.0, %v52_v29  ;;  %v71_v31 = vmul.f32 %v67_v27, %v67_v27 }
  0xb9   :  { %v66_v35 = vmax.f32 %v64_v30, 0.0  ;;  %v73_v37 = vmul.f32 %v71_v31, %v69_v28 }
  0xbb   :  { %v70_v38 = vmul.f32 %v66_v35, %v66_v35  ;;  %v84_v39 = vadd.f32 %v73_v37, %v63_v34 }
  0xbd   :  { %v72_v41 = vmul.f32 %v70_v38, %v68_v36  ;;  %v86_v42 = vsel %vm82_vm5, %v84_v39, 0.0 }
  0xbe   :  { %v89_v45 = vsel %vm87_vm6, %v86_v42, 0.0 }
  0xbf   :  { %v83_v43 = vadd.f32 %v72_v41, %v62_v40 }
  0xc1   :  { %v88_v44 = vsel %vm87_vm6, %v83_v43, 0.0 }
  0xc2   :  { %v90_v46 = vadd.f32 %v89_v45, %v88_v44 }
  0xc4   :  { %91 = vadd.xlane.f32.xlu1 %v90_v46 }
 0x14d   :  { %v92_v47 = vpop.xlane.xlu1 %91 }
 0x14e   :  { %v93_v48 = vrot.slane %v92_v47, 4 }
 0x150   :  { %v94_v49 = vadd.f32 %v93_v48, %v92_v47 }
 0x152   :  { %v95_v50 = vrot.slane %v94_v49, 2 }
 0x154   :  { %v96_v51 = vadd.f32 %v95_v50, %v94_v49 }
 0x156   :  { %v97_v52 = vrot.slane %v96_v51, 1 }
 0x158   :  { %v98_v53 = vadd.f32 %v97_v52, %v96_v51 }
 0x15a   :  { %117 = vpush %v98_v53 }
 0x18b   :  { %s118_s26 = spop %117 }
 0x18c   :  { %v100_v54 = vstv %s118_s26 }
 0x18d   :  { %101 = vst [vmem:[#allocation5] sm:$0xff] %v100_v54 }
 0x18e   :  { %158 = shalt.err (!%p155_p9)
}
 0x18f   :  { %111 = dma.vmem_to_hbm [thread:$0]  %s109_s25, 128, %s216_s3, [#allocation4]  }
 0x190   :  { %169 = dma.done.wait [#allocation4], 128  }
 0x191   :  { %170 = vsyncadd [#allocation4], 4294967168 }
 0x192   :  { %115 = vsyncpa [#allocation3], 1 }
 0x193   :  { %116 = vsyncpa [#allocation4], 1 }

</bundles_post_ra>
